<compile_context>
chip_gen: v7x
topology: tpu7x:2x2x1
jax: 0.10.0
libtpu: 0.0.40
codegen_flags: <defaults>
</compile_context>

<pallas_src>
import jax
import jax.numpy as jnp
from jax.experimental import pallas as pl
from jax.experimental.pallas import tpu as pltpu

_LANE = 128
_SUBLANE = 8
_MAX_BLOCK_ROWS = 2048          # 2048 * 128 * 4 B = 1 MiB per f32 block


def _round_up(x, m):
    return ((x + m - 1) // m) * m


# ---------------------------------------------------------------------------
# kernels
# ---------------------------------------------------------------------------

def _cfg_kernel(scale_ref, pos_ref, neg_ref, o_ref):
    """scaled = neg + (pos - neg) * cond_scale  (fused, f32 math)."""
    cs = scale_ref[0:1, :]                       # (1, LANE) broadcasts over rows
    pos = pos_ref[...].astype(jnp.float32)
    neg = neg_ref[...].astype(jnp.float32)
    o_ref[...] = (neg + (pos - neg) * cs).astype(o_ref.dtype)


def _cfg_slg_kernel(scale_ref, pos_ref, neg_ref, skip_ref, o_ref):
    """scaled = neg + (pos-neg)*cond_scale + (pos-skip)*slg  (fused, f32)."""
    cs = scale_ref[0:1, :]
    sg = scale_ref[1:2, :]
    pos = pos_ref[...].astype(jnp.float32)
    neg = neg_ref[...].astype(jnp.float32)
    skip = skip_ref[...].astype(jnp.float32)
    o_ref[...] = (neg + (pos - neg) * cs + (pos - skip) * sg).astype(o_ref.dtype)


# ---------------------------------------------------------------------------
# pallas_call wrapper
# ---------------------------------------------------------------------------

def _combine(kernel, scales_2d, arrays):
    """Run `kernel` over lane-dense (rows, 128) views of `arrays`."""
    out_dtype = arrays[0].dtype
    orig_shape = arrays[0].shape
    total = arrays[0].size

    rows = _round_up(max((total + _LANE - 1) // _LANE, 1), _SUBLANE)
    block_rows = min(_MAX_BLOCK_ROWS, rows)
    rows = _round_up(rows, block_rows)
    padded = rows * _LANE

    def to_2d(a):
        flat = jnp.ravel(a)
        if padded != total:
            flat = jnp.pad(flat, (0, padded - total))
        return flat.reshape(rows, _LANE)

    arrs_2d = [to_2d(a) for a in arrays]
    n_in = len(arrays)
    grid = (rows // block_rows,)

    data_spec = pl.BlockSpec((block_rows, _LANE), lambda i: (i, 0))
    scale_spec = pl.BlockSpec(scales_2d.shape, lambda i: (0, 0))

    itemsize = jnp.dtype(out_dtype).itemsize
    cost = pl.CostEstimate(
        flops=(2 * n_in - 1) * total,
        transcendentals=0,
        bytes_accessed=(n_in + 1) * total * itemsize,
    )

    out_2d = pl.pallas_call(
        kernel,
        out_shape=jax.ShapeDtypeStruct((rows, _LANE), out_dtype),
        grid_spec=pltpu.PrefetchScalarGridSpec(
            num_scalar_prefetch=0,
            grid=grid,
            in_specs=[scale_spec] + [data_spec] * n_in,
            out_specs=data_spec,
        ),
        compiler_params=pltpu.CompilerParams(
            dimension_semantics=("parallel",),
        ),
        cost_estimate=cost,
    )(scales_2d, *arrs_2d)

    return out_2d.reshape(-1)[:total].reshape(orig_shape)


@jax.jit
def cfg_combine(pos_out, neg_out, cond_scale):
    scales = jnp.broadcast_to(
        jnp.asarray(cond_scale, jnp.float32).reshape(1, 1), (1, _LANE))
    return _combine(_cfg_kernel, scales, [pos_out, neg_out])


@jax.jit
def cfg_slg_combine(pos_out, neg_out, skip_out, cond_scale, slg_scale):
    scales = jnp.broadcast_to(
        jnp.stack([jnp.asarray(cond_scale, jnp.float32),
                   jnp.asarray(slg_scale, jnp.float32)]).reshape(2, 1),
        (2, _LANE))
    return _combine(_cfg_slg_kernel, scales, [pos_out, neg_out, skip_out])


# ---------------------------------------------------------------------------
# SkipLayerCFGDenoiser (JAX port)
# ---------------------------------------------------------------------------

class SkipLayerCFGDenoiser:
    """JAX port of the SD3 SkipLayerCFGDenoiser forward.

    `model_fn(x, timestep, c_crossattn=..., y=..., skip_layers=..., **kw)`
    plays the role of `self.model.apply_model` in the PyTorch module.
    """

    def __init__(self, model_fn, steps, skip_layer_config):
        self.model_fn = model_fn
        self.steps = steps
        self.slg = skip_layer_config["scale"]
        self.skip_start = skip_layer_config["start"]
        self.skip_end = skip_layer_config["end"]
        self.skip_layers = skip_layer_config["layers"]
        self.step = 0

    def __call__(self, x, timestep, cond, uncond, cond_scale, **kwargs):
        # TODO(synk): the underlying diffusion model (SD3 MMDiT) is an external
        # network with no Pallas translation here; only the CFG/SLG combination
        # below runs as a Pallas kernel.
        batched = self.model_fn(
            jnp.concatenate([x, x], axis=0),
            jnp.concatenate([timestep, timestep], axis=0),
            c_crossattn=jnp.concatenate(
                [cond["c_crossattn"], uncond["c_crossattn"]], axis=0),
            y=jnp.concatenate([cond["y"], uncond["y"]], axis=0),
            **kwargs,
        )
        pos_out, neg_out = jnp.split(batched, 2, axis=0)

        slg_active = (
            self.slg > 0
            and self.step > self.skip_start * self.steps
            and self.step < self.skip_end * self.steps
        )
        if slg_active:
            skip_out = self.model_fn(
                x, timestep,
                c_crossattn=cond["c_crossattn"], y=cond["y"],
                skip_layers=self.skip_layers, **kwargs)
            scaled = cfg_slg_combine(pos_out, neg_out, skip_out,
                                     cond_scale, self.slg)
        else:
            scaled = cfg_combine(pos_out, neg_out, cond_scale)
        self.step += 1
        return scaled


# ---------------------------------------------------------------------------
# deterministic stand-in model + pure-JAX reference (for verification only)
# ---------------------------------------------------------------------------

def toy_apply_model(x, timestep, c_crossattn, y, skip_layers=()):
    """Deterministic stand-in for model.apply_model (NOT part of the kernel)."""
    t = timestep.reshape(-1, 1, 1, 1).astype(jnp.float32)
    ctx = jnp.mean(c_crossattn, axis=(1, 2)).reshape(-1, 1, 1, 1)
    yb = jnp.mean(y, axis=1).reshape(-1, 1, 1, 1)
    damp = 1.0 / (1.0 + 0.1 * len(skip_layers))
    out = jnp.tanh(0.5 * x + 0.1 * t) * damp + 0.05 * ctx + 0.02 * yb
    return out.astype(x.dtype)


def _reference_forward(step, steps, skip_cfg, x, timestep, cond, uncond,
                       cond_scale):
    batched = toy_apply_model(
        jnp.concatenate([x, x], axis=0),
        jnp.concatenate([timestep, timestep], axis=0),
        c_crossattn=jnp.concatenate(
            [cond["c_crossattn"], uncond["c_crossattn"]], axis=0),
        y=jnp.concatenate([cond["y"], uncond["y"]], axis=0),
    )
    pos_out, neg_out = jnp.split(batched, 2, axis=0)
    scaled = neg_out + (pos_out - neg_out) * cond_scale
    slg = skip_cfg["scale"]
    if (slg > 0 and step > skip_cfg["start"] * steps
            and step < skip_cfg["end"] * steps):
        skip_out = toy_apply_model(
            x, timestep, c_crossattn=cond["c_crossattn"], y=cond["y"],
            skip_layers=skip_cfg["layers"])
        scaled = scaled + (pos_out - skip_out) * slg
    return scaled


if __name__ == "__main__":
    key = jax.random.PRNGKey(0)
    ks = jax.random.split(key, 6)

    # Small shapes consistent with the module: batch=2, channels=4, spatial=16,
    # seq=8, hidden=32.
    N, C, H, W = 2, 4, 16, 16
    S, D, DY = 8, 32, 32

    x = jax.random.normal(ks[0], (N, C, H, W), jnp.float32)
    timestep = jax.random.uniform(ks[1], (N,), jnp.float32, 0.1, 1.0)
    cond = {"c_crossattn": jax.random.normal(ks[2], (N, S, D), jnp.float32),
            "y": jax.random.normal(ks[3], (N, DY), jnp.float32)}
    uncond = {"c_crossattn": jax.random.normal(ks[4], (N, S, D), jnp.float32),
              "y": jax.random.normal(ks[5], (N, DY), jnp.float32)}

    cond_scale = 5.0
    steps = 10
    skip_cfg = {"scale": 2.5, "start": 0.01, "end": 0.20, "layers": [7, 8, 9]}

    denoiser = SkipLayerCFGDenoiser(toy_apply_model, steps=steps,
                                    skip_layer_config=skip_cfg)

    # step 0: SLG window inactive -> plain fused CFG kernel.
    out0 = jax.block_until_ready(denoiser(x, timestep, cond, uncond, cond_scale))
    # step 1: SLG window active -> fused CFG + skip-layer-guidance kernel.
    out1 = jax.block_until_ready(denoiser(x, timestep, cond, uncond, cond_scale))

    ref0 = _reference_forward(0, steps, skip_cfg, x, timestep, cond, uncond,
                              cond_scale)
    ref1 = _reference_forward(1, steps, skip_cfg, x, timestep, cond, uncond,
                              cond_scale)

    assert out0.shape == (N, C, H, W), out0.shape
    assert out1.shape == (N, C, H, W), out1.shape
    assert jnp.allclose(out0, ref0, atol=1e-5, rtol=1e-5), "CFG path mismatch"
    assert jnp.allclose(out1, ref1, atol=1e-5, rtol=1e-5), "CFG+SLG path mismatch"

    print("KERNEL_OK")
</pallas_src>

<mosaic_0001>
module attributes {stable_mosaic.version = 11 : i64} {
  func.func @_cfg_kernel(%arg0: i32, %arg1: memref<1x128xf32, #tpu.memory_space<vmem>>, %arg2: memref<16x128xf32, #tpu.memory_space<vmem>>, %arg3: memref<16x128xf32, #tpu.memory_space<vmem>>, %arg4: memref<16x128xf32, #tpu.memory_space<vmem>>) attributes {dimension_semantics = [#tpu.dimension_semantics<parallel>], iteration_bounds = array<i64: 1>, scalar_prefetch = 0 : i64, scratch_operands = 0 : i64, tpu.core_type = #tpu.core_type<tc>, window_params = [{pipeline_mode = #tpu.pipeline_mode<synchronous>, transform_indices = @transform_0, window_bounds = array<i64: 1, 128>}, {transform_indices = @transform_1, window_bounds = array<i64: 16, 128>}, {transform_indices = @transform_2, window_bounds = array<i64: 16, 128>}, {transform_indices = @transform_3, window_bounds = array<i64: 16, 128>}]} {
    %c0 = arith.constant 0 : index
    %c0_0 = arith.constant 0 : index
    %0 = vector.load %arg1[%c0, %c0_0] : memref<1x128xf32, #tpu.memory_space<vmem>>, vector<1x128xf32>
    %c0_1 = arith.constant 0 : index
    %c0_2 = arith.constant 0 : index
    %1 = vector.load %arg2[%c0_1, %c0_2] : memref<16x128xf32, #tpu.memory_space<vmem>>, vector<16x128xf32>
    %c0_3 = arith.constant 0 : index
    %c0_4 = arith.constant 0 : index
    %2 = vector.load %arg3[%c0_3, %c0_4] : memref<16x128xf32, #tpu.memory_space<vmem>>, vector<16x128xf32>
    %3 = arith.subf %1, %2 : vector<16x128xf32>
    %4 = vector.broadcast %0 : vector<1x128xf32> to vector<16x128xf32>
    %5 = arith.mulf %3, %4 : vector<16x128xf32>
    %6 = arith.addf %2, %5 : vector<16x128xf32>
    %c0_5 = arith.constant 0 : index
    %c0_6 = arith.constant 0 : index
    %7 = vector.load %arg4[%c0_5, %c0_6] : memref<16x128xf32, #tpu.memory_space<vmem>>, vector<16x128xf32>
    tpu.vector_store %arg4[%c0_5, %c0_6], %6 {strides = array<i32>} : memref<16x128xf32, #tpu.memory_space<vmem>>, vector<16x128xf32>,
    return
  }
  func.func @transform_0(%arg0: i32) -> (i32, i32) {
    %c0_i32 = arith.constant 0 : i32
    %c0_i32_0 = arith.constant 0 : i32
    %c0_i32_1 = arith.constant 0 : i32
    return %c0_i32, %c0_i32_0 : i32, i32
  }
  func.func @transform_1(%arg0: i32) -> (i32, i32) {
    %c0_i32 = arith.constant 0 : i32
    %c0_i32_0 = arith.constant 0 : i32
    return %arg0, %c0_i32 : i32, i32
  }
  func.func @transform_2(%arg0: i32) -> (i32, i32) {
    %c0_i32 = arith.constant 0 : i32
    %c0_i32_0 = arith.constant 0 : i32
    return %arg0, %c0_i32 : i32, i32
  }
  func.func @transform_3(%arg0: i32) -> (i32, i32) {
    %c0_i32 = arith.constant 0 : i32
    %c0_i32_0 = arith.constant 0 : i32
    return %arg0, %c0_i32 : i32, i32
  }
}

</mosaic_0001>

<bundles_post_ra>
// kernel: cfg_combine.1
= control target key start
LH: loop header
LB: loop body
LE: loop exit
PB: predicated region body
PF: predicated region fallthrough
CT: control target
= control target key end

     0   :  { %s79_s0 = inlined_call_operand.vmem [shape: f32[1,128], index: 0, kind: input, shape index: {}]   ;;  %s80_s1 = inlined_call_operand.vmem [shape: f32[16,128], index: 1, kind: input, shape index: {}]   ;;  %s81_s2 = inlined_call_operand.vmem [shape: f32[16,128], index: 2, kind: input, shape index: {}]   ;;  %s82_s3 = inlined_call_operand.vmem [shape: f32[16,128], index: 3, kind: output, shape index: {}]  }
   0x1   :  { %v37_v0 = vld [vmem:[%s79_s0] ss:$0 sm:$0xff]  ;;  %v16_v4 = vld [vmem:[%s80_s1 + $0x8] sm:$0xff] }
   0x2   :  { %v15_v1 = vld [vmem:[%s80_s1] sm:$0xff]  ;;  %v18_v5 = vld [vmem:[%s81_s2 + $0x8] sm:$0xff] }
   0x3   :  { %v17_v2 = vld [vmem:[%s81_s2] sm:$0xff]  ;;  %v20_v6 = vsub.f32 %v16_v4, %v18_v5 }
   0x4   :  { %v19_v3 = vsub.f32 %v15_v1, %v17_v2 }
   0x5   :  { %v28_v8 = vmul.f32 %v37_v0, %v20_v6 }
   0x6   :  { %v27_v7 = vmul.f32 %v37_v0, %v19_v3 }
   0x7   :  { %v30_v10 = vadd.f32 %v28_v8, %v18_v5 }
   0x8   :  { %v29_v9 = vadd.f32 %v27_v7, %v17_v2 }
   0x9   :  { %32 = vst [vmem:[%s82_s3 + $0x8] sm:$0xff] %v30_v10 }
   0xa   :  { %31 = vst [vmem:[%s82_s3] sm:$0xff] %v29_v9 }

</bundles_post_ra>
